<compile_context>
chip_gen: v7x
topology: tpu7x:2x2x1
jax: 0.10.0
libtpu: 0.0.40
codegen_flags: <defaults>
</compile_context>

<pallas_src>
import functools

import jax
import jax.numpy as jnp
from jax import lax
from jax.experimental import pallas as pl
from jax.experimental.pallas import tpu as pltpu


# --------------------------- hardware introspection --------------------------

def _vmem_capacity_bytes():
    """Per-core VMEM capacity; falls back to the smallest production part."""
    try:
        return int(pltpu.get_tpu_info().vmem_capacity_bytes)
    except Exception:
        return 64 * 1024 * 1024          # v7x per-TensorCore VMEM (conservative)


# ------------------------------ Pallas kernels -------------------------------

def _conv_k9c_kernel(a_ref, w_ref, b_ref, o_ref):
    # a_ref : (TM, 9*C)   im2col taps, tap-major / channel-innermost
    # w_ref : (9*C, C)    flattened weights, same row order; grid-invariant
    # b_ref : (1, C)      bias (float32)
    # o_ref : (TM, C)     lane-dense output tile
    # Single K=9*C matmul: accumulation stays inside the MXU, no VMEM scratch.
    acc = jnp.dot(a_ref[...], w_ref[...], preferred_element_type=jnp.float32)
    o_ref[...] = (acc + b_ref[...]).astype(o_ref.dtype)


def _avgpool_kernel(x_ref, p_ref, o_ref):
    # x_ref : (TR, 2*W2)  row pairs (even row | odd row)
    # p_ref : (W2, Wo)    column-pairing matrix with the 0.25 scale folded in
    # o_ref : (TR, Wo)
    w = p_ref.shape[0]
    rows = x_ref[:, :w] + x_ref[:, w:]
    o_ref[...] = jnp.dot(rows, p_ref[...],
                         preferred_element_type=jnp.float32).astype(o_ref.dtype)


# ------------------------------ Tiling helpers --------------------------------

def _pick_tm_conv(p, c, in_itemsize, out_itemsize, vmem_limit, need_split):
    """Output-row tile for the conv matmul, sized from the real VMEM budget.

    Accounts for the (possibly double-buffered) resident (9C, C) weight block
    plus double-buffered tap/output blocks, with headroom for compiler scratch.
    """
    w_bytes = 9 * c * c * in_itemsize + c * 4
    per_row = 2 * (9 * c * in_itemsize) + 2 * (c * out_itemsize)
    avail = max(vmem_limit - 2 * w_bytes - (4 << 20), 1 << 20)
    tm = min(int(avail // per_row), 2048)
    if need_split:                       # >= 2 programs so both v7x TCs get work
        tm = min(tm, -(-p // 2))
    if tm >= p:
        return p
    return max(16, (tm // 16) * 16)      # 16-aligned: bf16 packs 16 rows / vreg


def _pick_tr_pool(r, row_in_bytes, row_out_bytes, vmem_limit):
    per_row = 2 * row_in_bytes + 2 * row_out_bytes
    tr = min(int((vmem_limit // 4) // max(per_row, 1)), 4096)
    if tr >= r:
        if r > 8:                        # split so both v7x TensorCores get work
            return ((-(-r // 2) + 7) // 8) * 8
        return r
    return max(8, (tr // 8) * 8)


# -------------------------------- Forward fns ---------------------------------

@functools.partial(jax.jit, static_argnames=("compute_dtype",))
def _downsample_conv(x, weight, bias, *, compute_dtype):
    B, C, H, W = x.shape
    Ho = (H - 2) // 2 + 1
    Wo = (W - 2) // 2 + 1
    P = Ho * Wo

    # ---- glue (XLA): NHWC + asymmetric pad + im2col (B, P, 9*C) -------------
    x_nhwc = jnp.transpose(x, (0, 2, 3, 1)).astype(compute_dtype)
    x_pad = jnp.pad(x_nhwc, ((0, 0), (0, 1), (0, 1), (0, 0)))   # F.pad (0,1,0,1)
    taps = jnp.concatenate(
        [x_pad[:, kh:kh + 2 * Ho:2, kw:kw + 2 * Wo:2, :].reshape(B, P, C)
         for kh in range(3) for kw in range(3)],
        axis=-1)                                                 # (B, P, 9*C)

    # weight (oc, ic, kh, kw) -> (kh, kw, ic, oc) -> (9*C, C); row order matches
    # the tap-major / channel-innermost layout of `taps`.
    w_flat = jnp.transpose(weight, (2, 3, 1, 0)).reshape(9 * C, C)
    w_flat = w_flat.astype(compute_dtype)
    bias2 = bias.reshape(1, C).astype(jnp.float32)

    in_it = jnp.dtype(compute_dtype).itemsize
    out_it = jnp.dtype(x.dtype).itemsize
    vmem_limit = min(_vmem_capacity_bytes() // 2, 96 * 1024 * 1024)
    TM = _pick_tm_conv(P, C, in_it, out_it, vmem_limit, need_split=(B < 2))
    grid = (B, pl.cdiv(P, TM))

    cost = pl.CostEstimate(
        flops=2 * B * P * 9 * C * C,
        transcendentals=0,
        bytes_accessed=(B * P * 9 * C * in_it + 9 * C * C * in_it
                        + C * 4 + B * P * C * out_it))

    out = pl.pallas_call(
        _conv_k9c_kernel,
        out_shape=jax.ShapeDtypeStruct((B, P, C), x.dtype),
        grid=grid,
        in_specs=[
            pl.BlockSpec((None, TM, 9 * C), lambda b, t: (b, t, 0)),
            pl.BlockSpec((9 * C, C), lambda b, t: (0, 0)),     # grid-invariant
            pl.BlockSpec((1, C), lambda b, t: (0, 0)),
        ],
        out_specs=pl.BlockSpec((None, TM, C), lambda b, t: (b, t, 0)),
        compiler_params=pltpu.CompilerParams(
            dimension_semantics=("parallel", "parallel"),
            vmem_limit_bytes=vmem_limit,
        ),
        cost_estimate=cost,
    )(taps, w_flat, bias2)

    # lane-dense (.., C) kernel output -> public NCHW
    return jnp.transpose(out.reshape(B, Ho, Wo, C), (0, 3, 1, 2))


@jax.jit
def _downsample_avgpool(x):
    B, C, H, W = x.shape
    Ho, Wo = H // 2, W // 2
    W2 = 2 * Wo
    if (H % 2) or (W % 2):                       # avg_pool2d floor behavior
        x = x[:, :, :2 * Ho, :W2]
    R = B * C * Ho
    xr = x.reshape(R, 2 * W2)                    # free reshape: row pairs

    # Column pairing + 0.25 scale folded into a tiny matmul on the idle MXU
    # (bf16 operands when the input is bf16 to avoid the slow f32 MXU on v5e).
    pool_dtype = x.dtype if x.dtype == jnp.bfloat16 else jnp.float32
    cols = jnp.arange(W2) // 2
    pool = ((cols[:, None] == jnp.arange(Wo)[None, :]).astype(pool_dtype)
            * jnp.asarray(0.25, pool_dtype))

    vmem_limit = min(_vmem_capacity_bytes() // 2, 96 * 1024 * 1024)
    it = x.dtype.itemsize
    TR = _pick_tr_pool(R, 2 * W2 * it, Wo * it, vmem_limit)

    # TODO(synk): when Wo < 128 the output stores are masked; folding several
    # output rows into the last dim would make them lane-dense, at the cost of
    # in-kernel lane slicing -- left simple since this path is HBM-bound.
    out = pl.pallas_call(
        _avgpool_kernel,
        out_shape=jax.ShapeDtypeStruct((R, Wo), x.dtype),
        grid=(pl.cdiv(R, TR),),
        in_specs=[
            pl.BlockSpec((TR, 2 * W2), lambda i: (i, 0)),
            pl.BlockSpec((W2, Wo), lambda i: (0, 0)),
        ],
        out_specs=pl.BlockSpec((TR, Wo), lambda i: (i, 0)),
        compiler_params=pltpu.CompilerParams(
            dimension_semantics=("parallel",),
            vmem_limit_bytes=vmem_limit,
        ),
    )(xr, pool)
    return out.reshape(B, C, Ho, Wo)


# -------------------------------- Module impl ----------------------------------

class Downsample:
    """JAX/Pallas port of the PyTorch Downsample module (forward only)."""

    def __init__(self, in_channels, with_conv, key=None,
                 compute_dtype=jnp.bfloat16):
        self.in_channels = in_channels
        self.with_conv = with_conv
        self.compute_dtype = compute_dtype
        if self.with_conv:
            if key is None:
                key = jax.random.PRNGKey(0)
            kw_, kb_ = jax.random.split(key)
            fan_in = in_channels * 3 * 3
            bound = 1.0 / (fan_in ** 0.5)
            # torch Conv2d weight layout: (out_C, in_C, kH, kW)
            self.weight = jax.random.uniform(
                kw_, (in_channels, in_channels, 3, 3),
                minval=-bound, maxval=bound, dtype=jnp.float32)
            self.bias = jax.random.uniform(
                kb_, (in_channels,), minval=-bound, maxval=bound,
                dtype=jnp.float32)

    def __call__(self, x):
        if self.with_conv:
            assert x.shape[1] == self.in_channels
            return _downsample_conv(x, self.weight, self.bias,
                                    compute_dtype=self.compute_dtype)
        return _downsample_avgpool(x)


# ------------------------------- Pure-JAX refs ---------------------------------

def _ref_forward(mod: Downsample, x):
    if mod.with_conv:
        x_pad = jnp.pad(x, ((0, 0), (0, 0), (0, 1), (0, 1)))
        y = lax.conv_general_dilated(
            x_pad, mod.weight, window_strides=(2, 2), padding="VALID",
            dimension_numbers=("NCHW", "OIHW", "NCHW"))
        return y + mod.bias.reshape(1, -1, 1, 1)
    B, C, H, W = x.shape
    xr = x[:, :, :2 * (H // 2), :2 * (W // 2)].reshape(
        B, C, H // 2, 2, W // 2, 2)
    return xr.mean(axis=(3, 5))


# ------------------------------------ Main -------------------------------------

if __name__ == "__main__":
    key = jax.random.PRNGKey(0)
    kx, kw = jax.random.split(key)
    B, C, H, W = 2, 4, 16, 16
    x = jax.random.normal(kx, (B, C, H, W), dtype=jnp.float32)

    # with_conv=True, bf16 MXU feed (default; f32 accumulation)
    ds_conv = Downsample(in_channels=C, with_conv=True, key=kw)
    y_conv = jax.block_until_ready(ds_conv(x))
    y_ref = _ref_forward(ds_conv, x)
    assert y_conv.shape == (B, C, 8, 8), y_conv.shape
    assert jnp.allclose(y_conv, y_ref, atol=5e-2, rtol=5e-2), (
        float(jnp.max(jnp.abs(y_conv - y_ref))))

    # with_conv=True, f32 MXU feed (tight check)
    ds_conv32 = Downsample(in_channels=C, with_conv=True, key=kw,
                           compute_dtype=jnp.float32)
    y32 = jax.block_until_ready(ds_conv32(x))
    assert jnp.allclose(y32, y_ref, atol=2e-4, rtol=2e-4), (
        float(jnp.max(jnp.abs(y32 - y_ref))))

    # with_conv=False (2x2 average pool)
    ds_pool = Downsample(in_channels=C, with_conv=False)
    y_pool = jax.block_until_ready(ds_pool(x))
    yp_ref = _ref_forward(ds_pool, x)
    assert y_pool.shape == (B, C, 8, 8), y_pool.shape
    assert jnp.allclose(y_pool, yp_ref, atol=1e-5, rtol=1e-5), (
        float(jnp.max(jnp.abs(y_pool - yp_ref))))

    print("KERNEL_OK")
</pallas_src>

<mosaic_0001>
module attributes {stable_mosaic.version = 11 : i64} {
  func.func @_conv_k9c_kernel(%arg0: i32, %arg1: i32, %arg2: memref<1x64x36xbf16, #tpu.memory_space<vmem>>, %arg3: memref<36x4xbf16, #tpu.memory_space<vmem>>, %arg4: memref<1x4xf32, #tpu.memory_space<vmem>>, %arg5: memref<1x64x4xf32, #tpu.memory_space<vmem>>) attributes {dimension_semantics = [#tpu.dimension_semantics<parallel>, #tpu.dimension_semantics<parallel>], iteration_bounds = array<i64: 2, 1>, scalar_prefetch = 0 : i64, scratch_operands = 0 : i64, tpu.core_type = #tpu.core_type<tc>, window_params = [{transform_indices = @transform_0, window_bounds = array<i64: 1, 64, 36>}, {pipeline_mode = #tpu.pipeline_mode<synchronous>, transform_indices = @transform_1, window_bounds = array<i64: 36, 4>}, {pipeline_mode = #tpu.pipeline_mode<synchronous>, transform_indices = @transform_2, window_bounds = array<i64: 1, 4>}, {transform_indices = @transform_3, window_bounds = array<i64: 1, 64, 4>}]} {
    %c0 = arith.constant 0 : index
    %c0_0 = arith.constant 0 : index
    %c0_1 = arith.constant 0 : index
    %0 = vector.load %arg2[%c0, %c0_0, %c0_1] : memref<1x64x36xbf16, #tpu.memory_space<vmem>>, vector<1x64x36xbf16>
    %1 = vector.shape_cast %0 : vector<1x64x36xbf16> to vector<64x36xbf16>
    %c0_2 = arith.constant 0 : index
    %c0_3 = arith.constant 0 : index
    %2 = vector.load %arg3[%c0_2, %c0_3] : memref<36x4xbf16, #tpu.memory_space<vmem>>, vector<36x4xbf16>
    %cst = arith.constant dense<0.000000e+00> : vector<64x4xf32>
    %3 = tpu.matmul %1, %2, %cst {dimension_numbers = #tpu.dot_dimension_numbers<[1], [0], [0], [1], [0, 0, 1, 1], [], []>} : vector<64x36xbf16>, vector<36x4xbf16>, vector<64x4xf32> -> vector<64x4xf32>
    %c0_4 = arith.constant 0 : index
    %c0_5 = arith.constant 0 : index
    %4 = vector.load %arg4[%c0_4, %c0_5] : memref<1x4xf32, #tpu.memory_space<vmem>>, vector<1x4xf32>
    %5 = vector.broadcast %4 : vector<1x4xf32> to vector<64x4xf32>
    %6 = arith.addf %3, %5 : vector<64x4xf32>
    %c0_6 = arith.constant 0 : index
    %c0_7 = arith.constant 0 : index
    %c0_8 = arith.constant 0 : index
    %7 = vector.load %arg5[%c0_6, %c0_7, %c0_8] : memref<1x64x4xf32, #tpu.memory_space<vmem>>, vector<1x64x4xf32>
    %8 = vector.shape_cast %7 : vector<1x64x4xf32> to vector<64x4xf32>
    %9 = vector.shape_cast %6 : vector<64x4xf32> to vector<1x64x4xf32>
    tpu.vector_store %arg5[%c0_6, %c0_7, %c0_8], %9 {strides = array<i32>} : memref<1x64x4xf32, #tpu.memory_space<vmem>>, vector<1x64x4xf32>,
    return
  }
  func.func @transform_0(%arg0: i32, %arg1: i32) -> (i32, i32, i32) {
    %c0_i32 = arith.constant 0 : i32
    %c0_i32_0 = arith.constant 0 : i32
    return %arg0, %arg1, %c0_i32 : i32, i32, i32
  }
  func.func @transform_1(%arg0: i32, %arg1: i32) -> (i32, i32) {
    %c0_i32 = arith.constant 0 : i32
    %c0_i32_0 = arith.constant 0 : i32
    %c0_i32_1 = arith.constant 0 : i32
    return %c0_i32, %c0_i32_0 : i32, i32
  }
  func.func @transform_2(%arg0: i32, %arg1: i32) -> (i32, i32) {
    %c0_i32 = arith.constant 0 : i32
    %c0_i32_0 = arith.constant 0 : i32
    %c0_i32_1 = arith.constant 0 : i32
    return %c0_i32, %c0_i32_0 : i32, i32
  }
  func.func @transform_3(%arg0: i32, %arg1: i32) -> (i32, i32, i32) {
    %c0_i32 = arith.constant 0 : i32
    %c0_i32_0 = arith.constant 0 : i32
    return %arg0, %arg1, %c0_i32 : i32, i32, i32
  }
}

</mosaic_0001>

<bundles_post_ra>
// kernel: _downsample_conv.1
= control target key start
LH: loop header
LB: loop body
LE: loop exit
PB: predicated region body
PF: predicated region fallthrough
CT: control target
= control target key end

     0   :  { %s573_s12 = smov 0   ;;  %s575_s13 = smov 0   ;;  %s626_s0 = inlined_call_operand.vmem [shape: bf16[2,64,36], index: 0, kind: input, shape index: {}]   ;;  %s627_s1 = inlined_call_operand.vmem [shape: bf16[36,4], index: 1, kind: input, shape index: {}]   ;;  %s628_s2 = inlined_call_operand.vmem [shape: f32[1,4], index: 2, kind: input, shape index: {}]   ;;  %s629_s3 = inlined_call_operand.vmem [shape: f32[2,64,4], index: 3, kind: output, shape index: {}]  }
   0x1   :  { %s577_s14 = smov 0  }
   0x2 LB: > { %s25_s15 = sadd.s32 1, %s547_s13  ;;  %p448_p0 = scmp.ge.s32.totalorder %s551_s14, 1  ;;  %s551_s14 = sphi %s577_s14, %s13_s14   ;;  %s547_s13 = sphi %s575_s13, %s631_s13   ;;  %s543_s12 = sphi %s573_s12, %s630_s12  }
   0x3   : > { %p27_p1 = scmp.ge.s32.totalorder %s25_s15, 2  ;;  %p158_p2 = scmp.lt.s32.totalorder %s551_s14, 3 }
   0x5   : > { %s633_s15 = smov (%p27_p1, %s25_s15), 0  ;;  %p159_p3 = pnand %p448_p0, %p158_p2 }
   0x6   : > { %v522_v0 = vld [vmem:[%s627_s1] sm:$0xff] (!%p159_p3)   ;;  %v523_v1 = vld [vmem:[%s627_s1 + $0x8] sm:$0xff] (!%p159_p3)   ;;  %p191_p4 = scmp.lt.s32.totalorder (!%p159_p3), %s543_s12, 1  ;;  %v524_v2 = vld [vmem:[%s627_s1 + $0x10] ss:$0 sps:$4 sm:$0x33] (!%p159_p3)  }
   0x7   : > { %162 = sbr.rel (%p159_p3) target bundleno = 237 (0xed), region = 32  ;;  %476 = vmatprep.subr.bf16.mxu0 (!%p159_p3), %v522_v0  ;;  %490 = vmatprep.subr.bf16.mxu1 (!%p159_p3), %v522_v0  ;;  %vm279_vm0 = vcmask (!%p159_p3), 1041408   ;;  %vm266_vm1 = vcmask (!%p159_p3), 293888   ;;  %v453_v8 = vld [vmem:[%s628_s2] ss:$0 sm:$0xff] (!%p159_p3)  ;;  %vm348_vm2 = vcmask (!%p159_p3), 31744  }
   0x8   : > { %477 = vmatpush3.bf16.msra.mxu0 (!%p159_p3), %v522_v0  ;;  %493 = vmatpush3.bf16.msra.mxu1 (!%p159_p3), %v522_v0  ;;  %v281_v4 = vsel (!%p159_p3), %vm279_vm0, %v524_v2, 0 }
   0x9   : > { %478 = vmatprep.subr.bf16.mxu0 (!%p159_p3), %v523_v1  ;;  %491 = vmatprep.subr.bf16.mxu1 (!%p159_p3), %v523_v1 }
   0xc   : > { %479 = vmatpush3.bf16.msra.mxu0 (!%p159_p3), %v523_v1  ;;  %494 = vmatpush3.bf16.msra.mxu1 (!%p159_p3), %v523_v1 }
   0xd   : > { %496 = vmatprep.subr.msk.bf16.mxu0 (!%p159_p3), %vm279_vm0, %v524_v2  ;;  %497 = vmatprep.subr.msk.bf16.mxu1 (!%p159_p3), %vm279_vm0, %v524_v2 }
   0xe   : > { %s635_s12 = smov (!%p191_p4, %s543_s12), 1 }
   0xf   : > { %s467_s22 = sshll.u32 %s635_s12, 5  ;;  %s468_s26 = sshll.u32 %s635_s12, 6 }
  0x10   : > { %s198_s25 = scalar_lea.vmem %s626_s0, %s467_s22  ;;  %481 = vmatpush3.bf16.msra.mxu0 %v281_v4  ;;  %495 = vmatpush3.bf16.msra.mxu1 %v281_v4  ;;  %s208_s4 = scalar_lea.vmem %s629_s3, %s468_s26 }
  0x11   : > { %v525_v3 = vld [vmem:[%s198_s25] sm:$0xff]   ;;  %v526_v5 = vld [vmem:[%s198_s25 + $0x10] sm:$0xff]   ;;  %v527_v6 = vld [vmem:[%s198_s25 + $0x8] sm:$0xff]  }
  0x12   : > { %482 = vmatprep.mubr.msk.bf16.mxu0 %vm266_vm1, %v525_v3  ;;  %486 = vmatprep.mubr.msk.bf16.mxu1 %vm266_vm1, %v526_v5  ;;  %v528_v7 = vld [vmem:[%s198_s25 + $0x18] sm:$0xff]  }
  0x13   : > { %483 = vmatmul.mubr.msk.bf16.vlgmr.msra.gmra.mrb[0].mxu0 %vm266_vm1, %v527_v6  ;;  %487 = vmatmul.mubr.msk.bf16.vlgmr.msra.gmra.mrb[0].mxu1 %vm266_vm1, %v528_v7 }
  0xe6   : > { %v484_v9 = vpop.f32.mrb[0].mxu0  ;;  %v488_v10 = vpop.f32.mrb[0].mxu1 }
  0xe7   : > { %v326_v11 = vadd.f32 %v484_v9, %v453_v8  ;;  %v342_v12 = vadd.f32 %v488_v10, %v453_v8  ;;  %v317_v13 = vpop.f32.mrb[1].mxu0  ;;  %v333_v14 = vpop.f32.mrb[1].mxu1 }
  0xe8   : > { %v318_v15 = vadd.f32 %v453_v8, %v317_v13  ;;  %v334_v16 = vadd.f32 %v453_v8, %v333_v14  ;;  %v485_v17 = vpop.f32.mrb[2].mxu0  ;;  %v489_v18 = vpop.f32.mrb[2].mxu1 }
  0xe9   : > { %351 = vst.msk [vmem:[%s208_s4 + $0x10] sm:$0xff] %vm348_vm2, %v326_v11  ;;  %355 = vst.msk [vmem:[%s208_s4 + $0x30] sm:$0xff] %vm348_vm2, %v342_v12  ;;  %v329_v19 = vadd.f32 %v485_v17, %v453_v8  ;;  %v345_v20 = vadd.f32 %v489_v18, %v453_v8  ;;  %v320_v21 = vpop.f32.mrb[3].mxu0  ;;  %v336_v22 = vpop.f32.mrb[3].mxu1 }
  0xea   : > { %349 = vst.msk [vmem:[%s208_s4] sm:$0xff] %vm348_vm2, %v318_v15  ;;  %353 = vst.msk [vmem:[%s208_s4 + $0x20] sm:$0xff] %vm348_vm2, %v334_v16  ;;  %v321_v23 = vadd.f32 %v453_v8, %v320_v21  ;;  %v337_v24 = vadd.f32 %v453_v8, %v336_v22 }
  0xeb   : > { %352 = vst.msk [vmem:[%s208_s4 + $0x18] sm:$0xff] %vm348_vm2, %v329_v19  ;;  %356 = vst.msk [vmem:[%s208_s4 + $0x38] sm:$0xff] %vm348_vm2, %v345_v20 }
  0xec   : > { %350 = vst.msk [vmem:[%s208_s4 + $0x8] sm:$0xff] %vm348_vm2, %v321_v23  ;;  %354 = vst.msk [vmem:[%s208_s4 + $0x28] sm:$0xff] %vm348_vm2, %v337_v24 }
  0xed PF: > { %s13_s14 = sadd.s32 1, %s551_s14   ;;  %s630_s12 = smov %s547_s13 }
  0xee   : > { %p10_p5 = scmp.ge.s32.totalorder %s13_s14, 4   ;;  %s631_s13 = smov %s633_s15 }
  0xf0   :  { %12 = sbr.rel (!%p10_p5) target bundleno = 2 (0x2), region = 62 }

</bundles_post_ra>
